<compile_context>
chip_gen: v6e
topology: v6e:2x2x1
jax: 0.10.0
libtpu: 0.0.40
codegen_flags: <defaults>
</compile_context>

<pallas_src>
import jax
import jax.numpy as jnp
from jax import lax
from jax.experimental import pallas as pl
from jax.experimental.pallas import tpu as pltpu


_SELECT_GATHER_MAX_B = 32   # up to this batch size, gather noise rows with VPU selects


def _round_up(a, b):
    return ((a + b - 1) // b) * b


def _make_kernel(batch_size):
    def kernel(idx_ref, x_ref, noise_ref, o_ref):
        # idx_ref:   (tm, 1)  int32 -- batch index per row of this tile
        # x_ref:     (tm, tf)       -- input tile
        # noise_ref: (B,  tf)       -- noise slab (full batch, this feature block)
        # o_ref:     (tm, tf)       -- output tile
        idx = idx_ref[...]                                   # (tm, 1)
        if batch_size <= _SELECT_GATHER_MAX_B:
            # Small batch: exact select-based gather on the VPU.  No MXU work,
            # no (tm, B) intermediate, bit-exact for arbitrary p.
            gathered = jnp.zeros(o_ref.shape, dtype=noise_ref.dtype)
            for b in range(batch_size):                      # static, unrolled
                row = noise_ref[pl.ds(b, 1), :]              # (1, tf)
                gathered = jnp.where(idx == b, row, gathered)
        else:
            # Larger batch: one-hot gather on the MXU.  HIGHEST precision keeps
            # the gathered 1/(1-p) values exact (no bf16 truncation).
            tm = idx.shape[0]
            bsz = noise_ref.shape[0]
            one_hot = (idx == lax.broadcasted_iota(jnp.int32, (tm, bsz), 1)
                       ).astype(jnp.float32)
            gathered = jnp.dot(one_hot, noise_ref[...].astype(jnp.float32),
                               preferred_element_type=jnp.float32,
                               precision=lax.Precision.HIGHEST)
        o_ref[...] = x_ref[...] * gathered.astype(x_ref.dtype)
    return kernel


def _vmem_limit_bytes():
    """Per-generation scoped VMEM limit: big on v5e/v6e, conservative on v7x."""
    cap = 64 * 1024 * 1024                      # safe fallback (v7x physical)
    try:
        info = pltpu.get_tpu_info()
        c = getattr(info, "vmem_capacity_bytes", None)
        if c:
            cap = int(c)
    except Exception:
        pass
    # Leave 16 MiB headroom below physical, never exceed 96 MiB, never below 32 MiB.
    return min(96 * 1024 * 1024, max(32 * 1024 * 1024, cap - 16 * 1024 * 1024))


def feature_dropout(x, batch_idxs, batch_size, *, p=0.5, train=True, key=None,
                    tm=2048):
    """Pallas implementation of FeatureDropout.forward.

    x:          (N, F) float array (N = total_len across the batch).
    batch_idxs: (N,) int array mapping each row to its batch element.
    batch_size: number of batch elements.
    tm:         requested row tile (rounded/clamped internally).
    """
    if p < 0 or p > 1:
        raise ValueError(
            "dropout probability has to be between 0 and 1, but got {}".format(p))
    N, F = x.shape
    batch_size = int(batch_size)

    if p == 0 or not train:
        # Eval / p==0: identity (clone semantics are a no-op for immutable arrays).
        return x

    # Deterministic noise generation (glue, plain JAX).
    if p == 1:
        noise = jnp.zeros((batch_size, F), dtype=x.dtype)
    else:
        if key is None:
            raise ValueError("key must be provided when train=True and 0 < p < 1")
        keep = jax.random.bernoulli(key, 1.0 - p, (batch_size, F))
        noise = keep.astype(x.dtype) / jnp.asarray(1.0 - p, dtype=x.dtype)

    itemsize = jnp.dtype(x.dtype).itemsize
    sub = {4: 8, 2: 16, 1: 32}.get(itemsize, 8)   # sublane multiple per dtype

    # Feature (lane) tiling: keep the full extent unless F is both 128-aligned
    # and very wide, in which case a second "parallel" grid axis keeps the row
    # tile large and the resident noise slab small.
    if F % 128 == 0 and F > 2048:
        tf = 2048
    else:
        tf = F
    tf_pad = _round_up(tf, 128)                   # lane-padded VMEM footprint
    b_pad = _round_up(batch_size, sub)            # sublane-padded noise rows

    vmem_limit = _vmem_limit_bytes()
    budget = (vmem_limit * 3) // 4                # headroom for compiler scratch
    use_mxu_gather = batch_size > _SELECT_GATHER_MAX_B

    def vmem_usage(rows):
        u = 2 * rows * tf_pad * itemsize          # x tile, double-buffered
        u += 2 * rows * tf_pad * itemsize         # out tile, double-buffered
        u += 2 * rows * 128 * 4                   # (tm,1) idx tile, lane-padded
        u += 2 * b_pad * tf_pad * itemsize        # resident noise slab
        u += rows * tf_pad * 4                    # f32 "gathered" intermediate
        if use_mxu_gather:
            u += rows * _round_up(batch_size, 128) * 4   # one-hot intermediate
        return u

    # Row tile: as large as possible (biggest lever on this HBM-bound kernel),
    # but (a) a sublane multiple, (b) <= the problem size, (c) leaving >= 8 grid
    # steps so v7x's two TensorCores both get work and the pipeline has blocks
    # to overlap, and (d) within the VMEM budget.
    min_steps = 8
    tm = max(sub, (int(tm) // sub) * sub)
    tm = min(tm, _round_up(N, sub))
    tm = min(tm, max(sub, _round_up(pl.cdiv(N, min_steps), sub)))
    while tm > sub and vmem_usage(tm) > budget:
        tm = max(sub, ((tm // 2) // sub) * sub)

    idx2d = batch_idxs.astype(jnp.int32).reshape(N, 1)

    # Feature axis is the OUTER grid axis so the noise block (which only depends
    # on it) is re-fetched once per feature block, not once per step.
    grid = (pl.cdiv(F, tf), pl.cdiv(N, tm))

    # TODO(synk): optionally single-buffer the noise slab (pl.Buffered(1)) and
    # alias x to the output (input_output_aliases) when run inside a training
    # step; both are small wins skipped here to keep the call maximally robust.
    out = pl.pallas_call(
        _make_kernel(batch_size),
        out_shape=jax.ShapeDtypeStruct((N, F), x.dtype),
        grid_spec=pltpu.PrefetchScalarGridSpec(
            num_scalar_prefetch=0,
            grid=grid,
            in_specs=[
                pl.BlockSpec((tm, 1), lambda j, i: (i, 0)),            # batch idx
                pl.BlockSpec((tm, tf), lambda j, i: (i, j)),           # input
                pl.BlockSpec((batch_size, tf), lambda j, i: (0, j)),   # noise
            ],
            out_specs=pl.BlockSpec((tm, tf), lambda j, i: (i, j)),
        ),
        compiler_params=pltpu.CompilerParams(
            dimension_semantics=("parallel", "parallel"),
            vmem_limit_bytes=int(vmem_limit)),
    )(idx2d, x, noise)
    return out


if __name__ == "__main__":
    key = jax.random.PRNGKey(0)
    k_x, k_noise, k_x2, k_noise2 = jax.random.split(key, 4)

    # Case 1: small deterministic example -- batch of 2 sentences (lengths 7, 9)
    # concatenated -> total_len = 16 rows, 32 features each.
    batch_size = 2
    lengths = [7, 9]
    N = sum(lengths)
    F = 32
    p = 0.5

    x = jax.random.normal(k_x, (N, F), dtype=jnp.float32)
    batch_idxs = jnp.concatenate(
        [jnp.full((l,), b, dtype=jnp.int32) for b, l in enumerate(lengths)])

    out = jax.block_until_ready(
        feature_dropout(x, batch_idxs, batch_size, p=p, train=True, key=k_noise))

    keep = jax.random.bernoulli(k_noise, 1.0 - p, (batch_size, F))
    noise_ref = keep.astype(x.dtype) / (1.0 - p)
    ref = x * noise_ref[batch_idxs, :]
    assert out.shape == (N, F) and out.dtype == x.dtype
    assert jnp.allclose(out, ref, atol=1e-6), "case 1 mismatch vs reference"

    # Case 2: ragged shapes and a "non-nice" p -- N not a multiple of the row
    # tile, F not a multiple of 128 -- exercises partial row blocks and masked
    # lane stores (no padded copies anywhere).
    batch_size2 = 3
    lengths2 = [50, 120, 130]
    N2 = sum(lengths2)
    F2 = 200
    p2 = 0.37
    x2 = jax.random.normal(k_x2, (N2, F2), dtype=jnp.float32)
    batch_idxs2 = jnp.concatenate(
        [jnp.full((l,), b, dtype=jnp.int32) for b, l in enumerate(lengths2)])

    out2 = jax.block_until_ready(
        feature_dropout(x2, batch_idxs2, batch_size2, p=p2, train=True,
                        key=k_noise2))
    keep2 = jax.random.bernoulli(k_noise2, 1.0 - p2, (batch_size2, F2))
    noise_ref2 = keep2.astype(x2.dtype) / (1.0 - p2)
    ref2 = x2 * noise_ref2[batch_idxs2, :]
    assert out2.shape == (N2, F2) and out2.dtype == x2.dtype
    assert jnp.allclose(out2, ref2, atol=1e-6), "case 2 mismatch vs reference"

    # p == 1: output must be exactly zero.
    out_p1 = jax.block_until_ready(
        feature_dropout(x, batch_idxs, batch_size, p=1.0, train=True, key=k_noise))
    assert jnp.allclose(out_p1, jnp.zeros_like(x))

    # Eval-mode path: identity.
    out_eval = jax.block_until_ready(
        feature_dropout(x, batch_idxs, batch_size, p=p, train=False))
    assert jnp.allclose(out_eval, x)

    print("KERNEL_OK")
</pallas_src>

<mosaic_0001>
module attributes {stable_mosaic.version = 11 : i64} {
  func.func @kernel(%arg0: i32, %arg1: i32, %arg2: memref<8x1xi32, #tpu.memory_space<vmem>>, %arg3: memref<8x32xf32, #tpu.memory_space<vmem>>, %arg4: memref<2x32xf32, #tpu.memory_space<vmem>>, %arg5: memref<8x32xf32, #tpu.memory_space<vmem>>) attributes {dimension_semantics = [#tpu.dimension_semantics<parallel>, #tpu.dimension_semantics<parallel>], iteration_bounds = array<i64: 1, 2>, scalar_prefetch = 0 : i64, scratch_operands = 0 : i64, tpu.core_type = #tpu.core_type<tc>, window_params = [{transform_indices = @transform_0, window_bounds = array<i64: 8, 1>}, {transform_indices = @transform_1, window_bounds = array<i64: 8, 32>}, {transform_indices = @transform_2, window_bounds = array<i64: 2, 32>}, {transform_indices = @transform_3, window_bounds = array<i64: 8, 32>}]} {
    %c0 = arith.constant 0 : index
    %c0_0 = arith.constant 0 : index
    %0 = vector.load %arg2[%c0, %c0_0] : memref<8x1xi32, #tpu.memory_space<vmem>>, vector<8x1xi32>
    %cst = arith.constant 0.000000e+00 : f32
    %1 = vector.broadcast %cst : f32 to vector<8x32xf32>
    %c0_1 = arith.constant 0 : index
    %c0_2 = arith.constant 0 : index
    %2 = vector.load %arg4[%c0_1, %c0_2] : memref<2x32xf32, #tpu.memory_space<vmem>>, vector<1x32xf32>
    %c0_i32 = arith.constant 0 : i32
    %3 = vector.broadcast %c0_i32 : i32 to vector<8x1xi32>
    %4 = arith.cmpi eq, %0, %3 : vector<8x1xi32>
    %5 = vector.shape_cast %4 : vector<8x1xi1> to vector<8x1xi1>
    %6 = vector.broadcast %5 : vector<8x1xi1> to vector<8x32xi1>
    %7 = vector.shape_cast %2 : vector<1x32xf32> to vector<1x32xf32>
    %8 = vector.broadcast %7 : vector<1x32xf32> to vector<8x32xf32>
    %9 = arith.select %6, %8, %1 : vector<8x32xi1>, vector<8x32xf32>
    %c1 = arith.constant 1 : index
    %c0_3 = arith.constant 0 : index
    %10 = vector.load %arg4[%c1, %c0_3] : memref<2x32xf32, #tpu.memory_space<vmem>>, vector<1x32xf32>
    %c1_i32 = arith.constant 1 : i32
    %11 = vector.broadcast %c1_i32 : i32 to vector<8x1xi32>
    %12 = arith.cmpi eq, %0, %11 : vector<8x1xi32>
    %13 = vector.shape_cast %12 : vector<8x1xi1> to vector<8x1xi1>
    %14 = vector.broadcast %13 : vector<8x1xi1> to vector<8x32xi1>
    %15 = vector.shape_cast %10 : vector<1x32xf32> to vector<1x32xf32>
    %16 = vector.broadcast %15 : vector<1x32xf32> to vector<8x32xf32>
    %17 = arith.select %14, %16, %9 : vector<8x32xi1>, vector<8x32xf32>
    %c0_4 = arith.constant 0 : index
    %c0_5 = arith.constant 0 : index
    %18 = vector.load %arg3[%c0_4, %c0_5] : memref<8x32xf32, #tpu.memory_space<vmem>>, vector<8x32xf32>
    %19 = arith.mulf %18, %17 : vector<8x32xf32>
    %c0_6 = arith.constant 0 : index
    %c0_7 = arith.constant 0 : index
    %20 = vector.load %arg5[%c0_6, %c0_7] : memref<8x32xf32, #tpu.memory_space<vmem>>, vector<8x32xf32>
    tpu.vector_store %arg5[%c0_6, %c0_7], %19 {strides = array<i32>} : memref<8x32xf32, #tpu.memory_space<vmem>>, vector<8x32xf32>,
    return
  }
  func.func @transform_0(%arg0: i32, %arg1: i32) -> (i32, i32) {
    %c0_i32 = arith.constant 0 : i32
    %c0_i32_0 = arith.constant 0 : i32
    return %arg1, %c0_i32 : i32, i32
  }
  func.func @transform_1(%arg0: i32, %arg1: i32) -> (i32, i32) {
    %c0_i32 = arith.constant 0 : i32
    return %arg1, %arg0 : i32, i32
  }
  func.func @transform_2(%arg0: i32, %arg1: i32) -> (i32, i32) {
    %c0_i32 = arith.constant 0 : i32
    %c0_i32_0 = arith.constant 0 : i32
    return %c0_i32, %arg0 : i32, i32
  }
  func.func @transform_3(%arg0: i32, %arg1: i32) -> (i32, i32) {
    %c0_i32 = arith.constant 0 : i32
    return %arg1, %arg0 : i32, i32
  }
}

</mosaic_0001>

<bundles_post_ra>
// kernel: tpu_custom_call.1
= control target key start
LH: loop header
LB: loop body
LE: loop exit
PB: predicated region body
PF: predicated region fallthrough
CT: control target
= control target key end

     0   :  { %8 = vsyncpa [#allocation3], 0  ;;  %s647_s0 = inlined_call_operand.vmem [shape: s32[16,1], index: 0, kind: input, shape index: {}]   ;;  %s648_s1 = inlined_call_operand.vmem [shape: f32[16,32], index: 1, kind: input, shape index: {}]   ;;  %s649_s2 = inlined_call_operand.vmem [shape: f32[2,32], index: 2, kind: input, shape index: {}]   ;;  %s650_s3 = inlined_call_operand.hbm [shape: f32[16,32], index: 3, kind: output, shape index: {}]  }
   0x1   :  { %10 = vsyncpa [#allocation3 + $0x1], 0  ;;  %s539_s12 = smov 0   ;;  %s541_s13 = smov 0  }
   0x2   :  { %s543_s14 = smov 0   ;;  %s545_s15 = smov 0  }
   0x3   :  { %s547_s16 = smov 0   ;;  %s549_s17 = smov 0  }
   0x4 LB: > { %s367_s18 = sadd.s32 4294967295, %s515_s17   ;;  %s368_s19 = sadd.s32 4294967294, %s515_s17   ;;  %s515_s17 = sphi %s549_s17, %s16_s17   ;;  %s511_s16 = sphi %s547_s16, %s657_s16   ;;  %s507_s15 = sphi %s545_s15, %s656_s15   ;;  %s503_s14 = sphi %s543_s14, %s655_s14   ;;  %s499_s13 = sphi %s541_s13, %s654_s13   ;;  %s495_s12 = sphi %s539_s12, %s653_s12  }
   0x5   : > { %s25_s20 = sadd.s32 1, %s511_s16  ;;  %s117_s21 = sadd.s32 1, %s503_s14 }
   0x6   : > { %p26_p0 = scmp.ge.s32.totalorder %s25_s20, 2  ;;  %p127_p1 = scmp.ne.s32.totalorder %s503_s14, %s499_s13 }
   0x7   : > { %p128_p2 = scmp.eq.s32.totalorder %s367_s18, 1  ;;  %p133_p3 = scmp.ne.s32.totalorder %s499_s13, %s495_s12 }
   0x8   : > { %s659_s20 = smov (%p26_p0, %s25_s20), 0  ;;  %p134_p5 = scmp.eq.s32.totalorder %s368_s19, 1 }
   0x9   : > { %p579_p4 = por %p128_p2, %p127_p1  ;;  %s112_s23 = ssub.s32 %s511_s16, %s659_s20 }
   0xa   : > { %p372_p6 = scmp.ge.s32.totalorder %s515_s17, 1  ;;  %p115_p7 = scmp.eq.s32.totalorder %s112_s23, 0 }
   0xb   : > { %p586_p8 = por %p134_p5, %p133_p3  ;;  %p176_p9 = scmp.lt.s32.totalorder %s515_s17, 3 }
   0xc   : > { %s592_s25 = scalar_select %p115_p7, %s503_s14, %s117_s21  }
   0xd   : > { %p177_p10 = pnand %p372_p6, %p176_p9 }
   0xe   : > { %p210_p11 = scmp.lt.s32.totalorder (!%p177_p10), %s507_s15, 1  ;;  %s207_s4 = sand.u32 (!%p177_p10), 1, %s499_s13  }
   0xf   : > { %180 = sbr.rel (%p177_p10) target bundleno = 172 (0xac), region = 32  ;;  %s373_s5 = sshll.u32 (!%p177_p10), %s207_s4, 3 }
  0x10   : > { %s379_s19 = sshll.u32 (!%p177_p10), %s507_s15, 7  ;;  %s209_s21 = scalar_lea.vmem (!%p177_p10), [#allocation2], %s373_s5 }
  0x11   : > { %s269_s23 = sshll.u32 (!%p177_p10), %s209_s21, 4  ;;  %s267_s28 = scalar_lea.hbm (!%p177_p10), %s650_s3, %s379_s19  ;;  %s270_s23 = int_to_ptr.vmem [resolvable:$true] %s269_s23 }
  0x12   : > { %s255_s29 = scalar_lea.sflag (!%p177_p10), [#allocation3], %s207_s4 }
  0x14   : > { %v517_v0 = vmov 0   ;;  %s211_s26 = scalar_select %p210_p11, %s507_s15, 1  ;;  %v376_v5 = vld [vmem:[%s649_s2] ss:$0 sm:$0xff]  ;;  %v377_v6 = vld [vmem:[%s649_s2 + $0x1] ss:$0 sm:$0xff] }
  0x15   : > { %438 = vset.pattern.permute.xlu0 %v517_v0  ;;  %vm252_vm4 = vcmask 261120   ;;  %s518_s15 = smov [#allocation2]  }
  0x16   : > { %s374_s27 = sshll.u32 %s211_s26, 3  ;;  %s443_s5 = sshll.u32 %s518_s15, 4  ;;  %s444_s5 = int_to_ptr.vmem [resolvable:$false] %s443_s5 }
  0x17   : > { %s213_s30 = scalar_lea.vmem %s647_s0, %s374_s27  ;;  %s220_s8 = scalar_lea.vmem %s648_s1, %s374_s27 }
  0x18   : > { %v225_v1 = vld [vmem:[%s213_s30] sm:$0xff]  ;;  %s439_s30 = scalar_lea.vmem %s270_s23, 128  ;;  %s445_s6 = scalar_lea.vmem %s444_s5, 256 }
  0x19   : > { %vm227_vm0 = vcmp.eq.s32.totalorder %v225_v1, 0  ;;  %vm239_vm1 = vcmp.eq.s32.totalorder %v225_v1, 1  ;;  %v250_v7 = vld [vmem:[%s220_s8] sm:$0xff]  ;;  %p440_p12 = scmp.ne.s32.totalorder %s270_s23, %s439_s30  ;;  %p446_p1 = scmp.lt.s32.totalorder %s270_s23, %s444_s5 }
  0x1a   : > { %v228_v2 = vsel %vm227_vm0, 1, %v517_v0  ;;  %v240_v3 = vsel %vm239_vm1, 1, %v517_v0  ;;  %p447_p2 = scmp.lt.s32.totalorder %s445_s6, %s439_s30 }
  0x1b   : > { %230 = vperm.xlu0 %438, %v228_v2   ;;  %p441_p13 = pnand %p440_p12, %p579_p4 }
  0x1c   : > { %p448_p3 = por %p447_p2, %p446_p1 }
  0x1d   : > { %p442_p0 = pneg %p441_p13 }
  0x1f   : > { %242 = vperm.xlu0 %438, %v240_v3   ;;  %p449_p5 = pnand %p448_p3, %p442_p0 }
  0x96   : > { %v231_v4 = vpop.permute.xlu0 %230 }
  0x97   : > { %vm232_vm2 = vcmp.eq.s32.totalorder %v231_v4, 1 }
  0x98   : > { %v237_v9 = vsel %vm232_vm2, %v376_v5, 0.0 }
  0x9a   : > { %v243_v8 = vpop.permute.xlu0 %242 }
  0x9b   : > { %vm244_vm3 = vcmp.eq.s32.totalorder %v243_v8, 1 }
  0x9c   : > { %v249_v10 = vsel %vm244_vm3, %v377_v6, %v237_v9 }
  0x9d   : > { %v251_v11 = vmul.f32 %v250_v7, %v249_v10 }
  0x9f   : > { %253 = vst.msk [vmem:[%s209_s21] sm:$0xff] %vm252_vm4, %v251_v11 }
  0xa0   : > { %452 = shalt.err (!%p449_p5)
}
  0xa1   : > { %s453_s7 = scalar_lea.hbm %s267_s28, 128  ;;  %s457_s9 = scalar_lea.hbm %s650_s3, 256 }
  0xa2   : > { %p454_p6 = scmp.ne.s32.totalorder %s267_s28, %s453_s7  ;;  %p458_p10 = scmp.lt.s32.totalorder %s267_s28, %s650_s3 }
  0xa3   : > { %p459_p11 = scmp.lt.s32.totalorder %s457_s9, %s453_s7 }
  0xa4   : > { %p455_p7 = pnand %p454_p6, %p579_p4 }
  0xa5   : > { %p460_p12 = por %p459_p11, %p458_p10 }
  0xa6   : > { %p456_p9 = pneg %p455_p7 }
  0xa8   : > { %p461_p13 = pnand %p460_p12, %p456_p9 }
  0xaa   : > { %464 = shalt.err (!%p461_p13)
}
  0xab   : > { %382 = dma.vmem_to_hbm [thread:$0]  (%p579_p4), %s270_s23, 128, %s267_s28, %s255_s29  }
  0xac PF: > { %p388_p0 = scmp.ge.s32.totalorder %s515_s17, 2  ;;  %s281_s18 = sand.u32 1, %s495_s12  }
  0xad   : > { %s282_s19 = scalar_lea.sflag [#allocation3], %s281_s18 }
  0xae   : > { %p385_p1 = pnand %p388_p0, %p586_p8 }
  0xb0   : > { %p386_p2 = pneg %p385_p1 }
  0xb2   : > { %490 = dma.done.wait (%p386_p2), %s282_s19, 128  }
  0xb3   : > { %492 = vsyncadd (%p386_p2), %s282_s19, 4294967168  ;;  %s16_s17 = sadd.s32 1, %s515_s17   ;;  %s653_s12 = smov %s499_s13 }
  0xb4   : > { %p13_p3 = scmp.ge.s32.totalorder %s16_s17, 4   ;;  %s654_s13 = smov %s503_s14 }
  0xb5   : > { %s655_s14 = smov %s592_s25  ;;  %s656_s15 = smov %s511_s16 }
  0xb6   : > { %s657_s16 = smov %s659_s20  ;;  %15 = sbr.rel (!%p13_p3) target bundleno = 4 (0x4), region = 73 }
  0xbb   :  { %287 = vsyncpa [#allocation3], 1 }
  0xbc   :  { %289 = vsyncpa [#allocation3 + $0x1], 1 }

</bundles_post_ra>
